<compile_context>
chip_gen: v5e
topology: v5e:2x2
jax: 0.10.0
libtpu: 0.0.40
codegen_flags: <defaults>
</compile_context>

<pallas_src>
import functools

import jax
import jax.numpy as jnp
from jax.experimental import pallas as pl
from jax.experimental.pallas import tpu as pltpu

ALPHA = 0.8        # mixing weight of the combined loss (module default)
NORM_EPS = 1e-12   # F.normalize default eps


def _combined_loss_kernel(x_ref, y_ref, out_ref, *, batch, blocks_per_split,
                          block_rows, inv_bd, inv_b, alpha, low_precision_softplus):
    c = pl.program_id(0)   # core-split index ("parallel")
    j = pl.program_id(1)   # reduction step within the split ("arbitrary")

    # Zero this split's resident partial accumulator at the start of its reduction loop.
    @pl.when(j == 0)
    def _():
        out_ref[...] = jnp.zeros_like(out_ref)

    x_raw = x_ref[...]
    y_raw = y_ref[...]
    x = x_raw.astype(jnp.float32)
    y = y_raw.astype(jnp.float32)
    tb = x.shape[0]

    # Global row ids of this block (unclamped index_map position) -> mask padded /
    # out-of-range rows.  Kept as a select so garbage (NaN/Inf) rows can't leak through.
    row0 = (c * blocks_per_split + j) * block_rows
    rows = row0 + jax.lax.broadcasted_iota(jnp.int32, (tb, 1), 0)
    valid = rows < batch                                                  # (tb, 1) bool

    # Hoisted product, reused by BCE cross-term and cosine dot (don't rely on CSE).
    xy = x * y

    # softplus(-|x|) = log1p(exp(-|x|)).  Optionally evaluated in the input (bf16)
    # dtype so the two EUP pushes/element are packed on v6e/v7x; block sums stay f32.
    if low_precision_softplus:
        sp = jnp.log1p(jnp.exp(-jnp.abs(x_raw))).astype(jnp.float32)
    else:
        sp = jnp.log1p(jnp.exp(-jnp.abs(x)))

    # ---- BCEWithLogitsLoss, stable form: max(x,0) - x*y + softplus(-|x|) ----
    # Reduce over the feature axis first, then apply the per-row validity mask.
    bce_row = jnp.sum(jnp.maximum(x, 0.0) - xy + sp, axis=-1, keepdims=True)  # (tb, 1)

    # ---- sce_loss: fused cosine via rsqrt, (1 - cos)^3 without pow ----
    dot = jnp.sum(xy, axis=-1, keepdims=True)                                 # (tb, 1)
    sx = jnp.sum(x * x, axis=-1, keepdims=True)
    sy = jnp.sum(y * y, axis=-1, keepdims=True)
    inv_norms = (jax.lax.rsqrt(jnp.maximum(sx, NORM_EPS * NORM_EPS)) *
                 jax.lax.rsqrt(jnp.maximum(sy, NORM_EPS * NORM_EPS)))
    t = 1.0 - dot * inv_norms
    sce_row = t * t * t

    bce_sum = jnp.sum(jnp.where(valid, bce_row, 0.0), keepdims=True)          # (1, 1)
    sce_sum = jnp.sum(jnp.where(valid, sce_row, 0.0), keepdims=True)          # (1, 1)

    # Means are linear: scale each block partial by the global 1/(B*D) and 1/B.
    contrib = alpha * inv_bd * bce_sum + (1.0 - alpha) * inv_b * sce_sum      # (1, 1)
    out_ref[0] += contrib


def _pick_block_rows(B, D, itemsize, *, buffers=2, target_bytes=4 << 20,
                     vmem_cap_bytes=44 << 20, temp_f32_blocks=4):
    """~4 MiB per input block (real dtype), multiple of 8 rows, whole pipeline
    (2 inputs x buffers) + f32 temporaries kept under vmem_cap_bytes."""
    if B <= 8:
        return B
    rows_tgt = target_bytes // max(1, D * itemsize)
    per_row = 2 * buffers * D * itemsize + temp_f32_blocks * D * 4
    rows_cap = (vmem_cap_bytes - (2 << 20)) // max(1, per_row)
    rows = min(rows_tgt, rows_cap, B)
    return max(8, (rows // 8) * 8)


def combined_loss(x, y, *, alpha=ALPHA, block_rows=None, num_core_splits=None,
                  input_buffers=2, low_precision_softplus=False):
    """x, y: (B, D) arrays (logits, targets). Returns scalar float32 combined loss."""
    assert x.shape == y.shape and x.ndim == 2, (x.shape, y.shape)
    B, D = x.shape
    itemsize = jnp.dtype(x.dtype).itemsize

    if block_rows is None:
        block_rows = _pick_block_rows(B, D, itemsize, buffers=input_buffers)
    block_rows = min(block_rows, B)
    if B > 8:
        block_rows = max(8, (block_rows // 8) * 8)
    # (if B <= 8 the block spans the full batch dim, which is always a legal block)

    num_blocks = pl.cdiv(B, block_rows)
    if num_core_splits is None:
        # 2-way split (v7x megacore) only when it divides the block count evenly, so no
        # split ever DMAs a clamped, fully-masked block (pure waste on 1-TC v5e/v6e).
        num_core_splits = 2 if (num_blocks % 2 == 0) else 1
    num_core_splits = max(1, min(num_core_splits, num_blocks))
    blocks_per_split = pl.cdiv(num_blocks, num_core_splits)

    def in_map(c, j):
        # Clamp fully-out-of-range blocks onto the last real block; their rows are
        # masked to zero inside the kernel so they contribute nothing.
        return (jnp.minimum(c * blocks_per_split + j, num_blocks - 1), 0)

    kernel = functools.partial(
        _combined_loss_kernel,
        batch=B,
        blocks_per_split=blocks_per_split,
        block_rows=block_rows,
        inv_bd=1.0 / float(B * D),
        inv_b=1.0 / float(B),
        alpha=float(alpha),
        low_precision_softplus=bool(low_precision_softplus),
    )

    # VMEM budget: 2 inputs x `input_buffers` pipeline buffers x native-dtype block,
    # plus ~4 f32-block temporaries (upcasts, x*y, BCE elementwise terms) + headroom.
    in_block_bytes = block_rows * D * itemsize
    f32_block_bytes = block_rows * D * 4
    vmem_need = 2 * input_buffers * in_block_bytes + 4 * f32_block_bytes + (4 << 20)
    vmem_limit = int(min(max(vmem_need, 32 << 20), 48 << 20))

    def mk_in_spec():
        if input_buffers == 2:
            return pl.BlockSpec((block_rows, D), in_map)
        return pl.BlockSpec((block_rows, D), in_map,
                            pipeline_mode=pl.Buffered(input_buffers))

    partials = pl.pallas_call(
        kernel,
        out_shape=jax.ShapeDtypeStruct((num_core_splits, 1, 1), jnp.float32),
        grid=(num_core_splits, blocks_per_split),
        in_specs=[mk_in_spec(), mk_in_spec()],
        out_specs=pl.BlockSpec((1, 1, 1), lambda c, j: (c, 0, 0)),
        compiler_params=pltpu.CompilerParams(
            dimension_semantics=("parallel", "arbitrary"),
            vmem_limit_bytes=vmem_limit),
    )(x, y)
    return jnp.sum(partials)


def _reference(x, y, alpha=ALPHA):
    x = x.astype(jnp.float32)
    y = y.astype(jnp.float32)
    bce = jnp.mean(jnp.maximum(x, 0.0) - x * y + jnp.log1p(jnp.exp(-jnp.abs(x))))
    xn = x / jnp.maximum(jnp.linalg.norm(x, axis=-1, keepdims=True), NORM_EPS)
    yn = y / jnp.maximum(jnp.linalg.norm(y, axis=-1, keepdims=True), NORM_EPS)
    sce = jnp.mean((1.0 - jnp.sum(xn * yn, axis=-1)) ** 3)
    return alpha * bce + (1.0 - alpha) * sce


if __name__ == "__main__":
    key = jax.random.PRNGKey(0)
    kx, ky = jax.random.split(key)
    # Small demo shapes; lane-dense feature dim (multiple of 128), B not a multiple of
    # the forced tile size so the masked/clamped paths run.
    B, D = 40, 128
    x = jax.random.normal(kx, (B, D), dtype=jnp.float32)    # logits
    y = jax.random.uniform(ky, (B, D), dtype=jnp.float32)   # targets in [0, 1]

    ref = _reference(x, y)

    # 1) Default config (dtype-aware auto block size -> single block at this tiny B).
    loss = combined_loss(x, y)
    jax.block_until_ready(loss)
    assert jnp.allclose(loss, ref, rtol=1e-5, atol=1e-5), (loss, ref)

    # 2) Forced tiling + 2-way core split: exercises the ragged last block and the
    #    clamped, fully-masked block path (grid (2, 2), 3 real blocks).
    loss2 = combined_loss(x, y, block_rows=16, num_core_splits=2)
    jax.block_until_ready(loss2)
    assert jnp.allclose(loss2, ref, rtol=1e-5, atol=1e-5), (loss2, ref)

    # 3) bf16 inputs (halved HBM traffic) with the packed bf16 softplus path; compare
    #    against the f32 reference computed on the same upcast bf16 values.
    xb = x.astype(jnp.bfloat16)
    yb = y.astype(jnp.bfloat16)
    loss3 = combined_loss(xb, yb, block_rows=16, low_precision_softplus=True)
    jax.block_until_ready(loss3)
    ref3 = _reference(xb, yb)
    assert jnp.allclose(loss3, ref3, rtol=2e-2, atol=2e-3), (loss3, ref3)

    print("KERNEL_OK")
</pallas_src>

<mosaic_0001>
module attributes {stable_mosaic.version = 11 : i64} {
  func.func @_combined_loss_kernel(%arg0: i32, %arg1: i32, %arg2: memref<40x128xf32, #tpu.memory_space<vmem>>, %arg3: memref<40x128xf32, #tpu.memory_space<vmem>>, %arg4: memref<1x1x1xf32, #tpu.memory_space<vmem>>) attributes {dimension_semantics = [#tpu.dimension_semantics<parallel>, #tpu.dimension_semantics<arbitrary>], iteration_bounds = array<i64: 1, 1>, scalar_prefetch = 0 : i64, scratch_operands = 0 : i64, tpu.core_type = #tpu.core_type<tc>, window_params = [{transform_indices = @transform_0, window_bounds = array<i64: 40, 128>}, {transform_indices = @transform_1, window_bounds = array<i64: 40, 128>}, {transform_indices = @transform_2, window_bounds = array<i64: 1, 1, 1>}]} {
    %c0_i32 = arith.constant 0 : i32
    %0 = arith.cmpi eq, %arg1, %c0_i32 : i32
    %1 = arith.extui %0 : i1 to i32
    %c0_i32_0 = arith.constant 0 : i32
    %2 = arith.cmpi ne, %1, %c0_i32_0 : i32
    scf.if %2 {
      %cst_25 = arith.constant 0.000000e+00 : f32
      %70 = vector.broadcast %cst_25 : f32 to vector<1x1x1xf32>
      %c0_26 = arith.constant 0 : index
      %c0_27 = arith.constant 0 : index
      %c0_28 = arith.constant 0 : index
      %71 = vector.load %arg4[%c0_26, %c0_27, %c0_28] : memref<1x1x1xf32, #tpu.memory_space<vmem>>, vector<1x1x1xf32>
      tpu.vector_store %arg4[%c0_26, %c0_27, %c0_28], %70 {strides = array<i32>} : memref<1x1x1xf32, #tpu.memory_space<vmem>>, vector<1x1x1xf32>,
    } else {
    }
    %c0 = arith.constant 0 : index
    %c0_1 = arith.constant 0 : index
    %3 = vector.load %arg2[%c0, %c0_1] : memref<40x128xf32, #tpu.memory_space<vmem>>, vector<40x128xf32>
    %c0_2 = arith.constant 0 : index
    %c0_3 = arith.constant 0 : index
    %4 = vector.load %arg3[%c0_2, %c0_3] : memref<40x128xf32, #tpu.memory_space<vmem>>, vector<40x128xf32>
    %c1_i32 = arith.constant 1 : i32
    %5 = arith.muli %arg0, %c1_i32 : i32
    %6 = arith.addi %5, %arg1 : i32
    %c40_i32 = arith.constant 40 : i32
    %7 = arith.muli %6, %c40_i32 : i32
    %8 = tpu.iota {dimensions = array<i32: 0>} : vector<40x1xi32>
    %9 = vector.broadcast %7 : i32 to vector<40x1xi32>
    %10 = arith.addi %9, %8 : vector<40x1xi32>
    %c40_i32_4 = arith.constant 40 : i32
    %11 = vector.broadcast %c40_i32_4 : i32 to vector<40x1xi32>
    %12 = arith.cmpi slt, %10, %11 : vector<40x1xi32>
    %13 = arith.mulf %3, %4 : vector<40x128xf32>
    %14 = math.absf %3 : vector<40x128xf32>
    %cst = arith.constant 0.000000e+00 : f32
    %15 = vector.broadcast %cst : f32 to vector<40x128xf32>
    %16 = arith.subf %15, %14 : vector<40x128xf32>
    %17 = math.exp %16 : vector<40x128xf32>
    %18 = math.log1p %17 : vector<40x128xf32>
    %cst_5 = arith.constant 0.000000e+00 : f32
    %19 = vector.broadcast %cst_5 : f32 to vector<40x128xf32>
    %20 = arith.maximumf %3, %19 : vector<40x128xf32>
    %21 = arith.subf %20, %13 : vector<40x128xf32>
    %22 = arith.addf %21, %18 : vector<40x128xf32>
    %cst_6 = arith.constant dense<0.000000e+00> : vector<40xf32>
    %23 = vector.multi_reduction <add>, %22, %cst_6 [1] : vector<40x128xf32> to vector<40xf32>
    %24 = vector.shape_cast %23 : vector<40xf32> to vector<40x1xf32>
    %cst_7 = arith.constant dense<0.000000e+00> : vector<40xf32>
    %25 = vector.multi_reduction <add>, %13, %cst_7 [1] : vector<40x128xf32> to vector<40xf32>
    %26 = vector.shape_cast %25 : vector<40xf32> to vector<40x1xf32>
    %27 = arith.mulf %3, %3 : vector<40x128xf32>
    %cst_8 = arith.constant dense<0.000000e+00> : vector<40xf32>
    %28 = vector.multi_reduction <add>, %27, %cst_8 [1] : vector<40x128xf32> to vector<40xf32>
    %29 = vector.shape_cast %28 : vector<40xf32> to vector<40x1xf32>
    %30 = arith.mulf %4, %4 : vector<40x128xf32>
    %cst_9 = arith.constant dense<0.000000e+00> : vector<40xf32>
    %31 = vector.multi_reduction <add>, %30, %cst_9 [1] : vector<40x128xf32> to vector<40xf32>
    %32 = vector.shape_cast %31 : vector<40xf32> to vector<40x1xf32>
    %cst_10 = arith.constant 1.000000e-24 : f32
    %33 = vector.broadcast %cst_10 : f32 to vector<40x1xf32>
    %34 = arith.maximumf %29, %33 : vector<40x1xf32>
    %35 = math.rsqrt %34 : vector<40x1xf32>
    %cst_11 = arith.constant 1.000000e-24 : f32
    %36 = vector.broadcast %cst_11 : f32 to vector<40x1xf32>
    %37 = arith.maximumf %32, %36 : vector<40x1xf32>
    %38 = math.rsqrt %37 : vector<40x1xf32>
    %39 = arith.mulf %35, %38 : vector<40x1xf32>
    %40 = arith.mulf %26, %39 : vector<40x1xf32>
    %cst_12 = arith.constant 1.000000e+00 : f32
    %41 = vector.broadcast %cst_12 : f32 to vector<40x1xf32>
    %42 = arith.subf %41, %40 : vector<40x1xf32>
    %43 = arith.mulf %42, %42 : vector<40x1xf32>
    %44 = arith.mulf %43, %42 : vector<40x1xf32>
    %cst_13 = arith.constant 0.000000e+00 : f32
    %45 = vector.broadcast %cst_13 : f32 to vector<40x1xf32>
    %46 = arith.select %12, %24, %45 : vector<40x1xi1>, vector<40x1xf32>
    %47 = vector.shape_cast %46 : vector<40x1xf32> to vector<1x40x1xf32>
    %cst_14 = arith.constant dense<0.000000e+00> : vector<1xf32>
    %48 = vector.multi_reduction <add>, %47, %cst_14 [1, 2] : vector<1x40x1xf32> to vector<1xf32>
    %49 = vector.shape_cast %48 : vector<1xf32> to vector<1x1x1xf32>
    %50 = vector.extract %49[0, 0, 0] : f32 from vector<1x1x1xf32>
    %51 = vector.broadcast %50 : f32 to vector<1x1xf32>
    %cst_15 = arith.constant 0.000000e+00 : f32
    %52 = vector.broadcast %cst_15 : f32 to vector<40x1xf32>
    %53 = arith.select %12, %44, %52 : vector<40x1xi1>, vector<40x1xf32>
    %54 = vector.shape_cast %53 : vector<40x1xf32> to vector<1x40x1xf32>
    %cst_16 = arith.constant dense<0.000000e+00> : vector<1xf32>
    %55 = vector.multi_reduction <add>, %54, %cst_16 [1, 2] : vector<1x40x1xf32> to vector<1xf32>
    %56 = vector.shape_cast %55 : vector<1xf32> to vector<1x1x1xf32>
    %57 = vector.extract %56[0, 0, 0] : f32 from vector<1x1x1xf32>
    %58 = vector.broadcast %57 : f32 to vector<1x1xf32>
    %cst_17 = arith.constant 1.562500e-04 : f32
    %59 = vector.broadcast %cst_17 : f32 to vector<1x1xf32>
    %60 = arith.mulf %59, %51 : vector<1x1xf32>
    %cst_18 = arith.constant 5.000000e-03 : f32
    %61 = vector.broadcast %cst_18 : f32 to vector<1x1xf32>
    %62 = arith.mulf %61, %58 : vector<1x1xf32>
    %63 = arith.addf %60, %62 : vector<1x1xf32>
    %c0_19 = arith.constant 0 : index
    %c0_20 = arith.constant 0 : index
    %c0_21 = arith.constant 0 : index
    %64 = vector.load %arg4[%c0_19, %c0_20, %c0_21] : memref<1x1x1xf32, #tpu.memory_space<vmem>>, vector<1x1x1xf32>
    %65 = vector.shape_cast %64 : vector<1x1x1xf32> to vector<1x1xf32>
    %66 = arith.addf %65, %63 : vector<1x1xf32>
    %c0_22 = arith.constant 0 : index
    %c0_23 = arith.constant 0 : index
    %c0_24 = arith.constant 0 : index
    %67 = vector.load %arg4[%c0_22, %c0_23, %c0_24] : memref<1x1x1xf32, #tpu.memory_space<vmem>>, vector<1x1x1xf32>
    %68 = vector.shape_cast %67 : vector<1x1x1xf32> to vector<1x1xf32>
    %69 = vector.shape_cast %66 : vector<1x1xf32> to vector<1x1x1xf32>
    tpu.vector_store %arg4[%c0_22, %c0_23, %c0_24], %69 {strides = array<i32>} : memref<1x1x1xf32, #tpu.memory_space<vmem>>, vector<1x1x1xf32>,
    return
  }
  func.func @transform_0(%arg0: i32, %arg1: i32) -> (i32, i32) {
    %c1_i32 = arith.constant 1 : i32
    %0 = arith.muli %arg0, %c1_i32 : i32
    %1 = arith.addi %0, %arg1 : i32
    %c0_i32 = arith.constant 0 : i32
    %2 = arith.minsi %1, %c0_i32 : i32
    %c0_i32_0 = arith.constant 0 : i32
    %c0_i32_1 = arith.constant 0 : i32
    return %2, %c0_i32_0 : i32, i32
  }
  func.func @transform_1(%arg0: i32, %arg1: i32) -> (i32, i32) {
    %c1_i32 = arith.constant 1 : i32
    %0 = arith.muli %arg0, %c1_i32 : i32
    %1 = arith.addi %0, %arg1 : i32
    %c0_i32 = arith.constant 0 : i32
    %2 = arith.minsi %1, %c0_i32 : i32
    %c0_i32_0 = arith.constant 0 : i32
    %c0_i32_1 = arith.constant 0 : i32
    return %2, %c0_i32_0 : i32, i32
  }
  func.func @transform_2(%arg0: i32, %arg1: i32) -> (i32, i32, i32) {
    %c0_i32 = arith.constant 0 : i32
    %c0_i32_0 = arith.constant 0 : i32
    %c0_i32_1 = arith.constant 0 : i32
    return %arg0, %c0_i32, %c0_i32_0 : i32, i32, i32
  }
}

</mosaic_0001>

<bundles_post_ra>
// kernel: tpu_custom_call.1
= control target key start
LH: loop header
LB: loop body
LE: loop exit
PB: predicated region body
PF: predicated region fallthrough
CT: control target
= control target key end

     0   :  { %7 = vsyncpa [#allocation3], 0  ;;  %s818_s0 = inlined_call_operand.hbm [shape: f32[40,128], index: 0, kind: input, shape index: {}]   ;;  %s819_s1 = inlined_call_operand.hbm [shape: f32[40,128], index: 1, kind: input, shape index: {}]   ;;  %s820_s2 = inlined_call_operand.hbm [shape: f32[1,1,1], index: 2, kind: output, shape index: {}]  }
   0x1   :  { %8 = vsyncpa [#allocation6], 0 }
   0x2   :  { %9 = vsyncpa [#allocation4], 0  ;;  %s20_s11 = sshll.u32 %s818_s0, 4  ;;  %s575_s12 = smov [#allocation2]   ;;  %s21_s11 = int_to_ptr.hbm [resolvable:$true] %s20_s11 }
   0x3   :  { %s22_s13 = sshll.u32 %s575_s12, 4  ;;  %s39_s16 = sshll.u32 %s819_s1, 4  ;;  %s23_s13 = int_to_ptr.vmem [resolvable:$true] %s22_s13  ;;  %s40_s16 = int_to_ptr.hbm [resolvable:$true] %s39_s16 }
   0x4   :  { %s576_s17 = smov 128   ;;  %s577_s18 = smov 8  }
   0x5   :  { %28 = dma.hbm_to_vmem [thread:$0]  %s21_s11, 640, %s23_s13, [#allocation3], %s576_s17, %s576_s17, %s577_s18  }
   0x6   :  { %s578_s19 = smov [#allocation5]  }
   0x7   :  { %s41_s20 = sshll.u32 %s578_s19, 4  ;;  %s42_s20 = int_to_ptr.vmem [resolvable:$true] %s41_s20 }
   0x8   :  { %47 = dma.hbm_to_vmem [thread:$0]  %s40_s16, 640, %s42_s20, [#allocation6], %s576_s17, %s576_s17, %s577_s18  }
   0x9   :  { %569 = dma.done.wait [#allocation3], 640  }
   0xa   :  { %570 = vsyncadd [#allocation3], 4294966656 }
   0xb   :  { %571 = dma.done.wait [#allocation6], 640  }
   0xc   :  { %572 = vsyncadd [#allocation6], 4294966656  ;;  %v75_v0 = vld [vmem:[#allocation5] sm:$0xff]  ;;  %v602_v1 = vld [vmem:[#allocation2 + $0x10] sm:$0xff]  ;;  %s580_s21 = smov [#allocation7]   ;;  %s432_s25 = sshll.u32 %s820_s2, 4  ;;  %s433_s25 = int_to_ptr.hbm [resolvable:$true] %s432_s25 }
   0xd   :  { %v604_v2 = vld [vmem:[#allocation2] sm:$0xff]  ;;  %v219_v3 = vmul.f32 %v75_v0, %v75_v0  ;;  %v206_v4 = vmul.f32 %v602_v1, %v602_v1  ;;  %v106_v5 = vand.u32 2147483647, %v602_v1  ;;  %v611_v7 = vld [vmem:[#allocation2 + $0x8] sm:$0xff]  ;;  %v76_v12 = vld [vmem:[#allocation5 + $0x8] sm:$0xff]  ;;  %s430_s22 = sshll.u32 %s580_s21, 4  ;;  %s431_s22 = int_to_ptr.vmem [resolvable:$true] %s430_s22 }
   0xe   :  { %v204_v6 = vmul.f32 %v604_v2, %v604_v2  ;;  %v104_v8 = vand.u32 2147483647, %v604_v2  ;;  %v105_v9 = vand.u32 2147483647, %v611_v7  ;;  %v77_v13 = vld [vmem:[#allocation5 + $0x10] sm:$0xff]  ;;  %v615_v16 = vld [vmem:[#allocation2 + $0x20] sm:$0xff]  ;;  %v220_v21 = vmul.f32 %v76_v12, %v76_v12 }
   0xf   :  { %224 = vadd.xlane.f32.xlu1 %v219_v3  ;;  %213 = vadd.xlane.f32.xlu2 %v206_v4  ;;  %v111_v10 = vsub.f32 0.0, %v106_v5  ;;  %v108_v18 = vand.u32 2147483647, %v615_v16  ;;  %v618_v19 = vld [vmem:[#allocation2 + $0x18] sm:$0xff]  ;;  %v221_v22 = vmul.f32 %v77_v13, %v77_v13  ;;  %v205_v24 = vmul.f32 %v611_v7, %v611_v7  ;;  %v78_v27 = vld [vmem:[#allocation5 + $0x18] sm:$0xff]  ;;  %v79_v39 = vld [vmem:[#allocation5 + $0x20] sm:$0xff] }
  0x10   :  { %209 = vadd.xlane.f32.xlu0 %v204_v6  ;;  %v109_v11 = vsub.f32 0.0, %v104_v8  ;;  %v110_v14 = vsub.f32 0.0, %v105_v9  ;;  %v107_v23 = vand.u32 2147483647, %v618_v19  ;;  %v222_v30 = vmul.f32 %v78_v27, %v78_v27 }
  0x11   :  { %v118_v15 = vmul.f32 1.442695, %v111_v10  ;;  %v113_v25 = vsub.f32 0.0, %v108_v18  ;;  %v208_v31 = vmul.f32 %v615_v16, %v615_v16  ;;  %v207_v34 = vmul.f32 %v618_v19, %v618_v19 }
  0x12   :  { %v116_v17 = vmul.f32 1.442695, %v110_v14  ;;  %v114_v20 = vmul.f32 1.442695, %v109_v11  ;;  %v112_v26 = vsub.f32 0.0, %v107_v23  ;;  %v99_v40 = vmul.f32 %v75_v0, %v604_v2 }
  0x13   :  { %457 = vpow2.f32 %v118_v15  ;;  %v122_v28 = vmul.f32 1.442695, %v113_v25  ;;  %v100_v41 = vmul.f32 %v76_v12, %v611_v7  ;;  %v223_v45 = vmul.f32 %v79_v39, %v79_v39 }
  0x14   :  { %459 = vpow2.f32 %v116_v17  ;;  %v120_v32 = vmul.f32 1.442695, %v112_v26  ;;  %v101_v53 = vmul.f32 %v77_v13, %v602_v1  ;;  %v102_v56 = vmul.f32 %v78_v27, %v618_v19 }
  0x15   :  { %461 = vpow2.f32 %v114_v20  ;;  %v103_v57 = vmul.f32 %v79_v39, %v615_v16  ;;  %v169_v62 = vmax.f32 %v604_v2, 0.0  ;;  %v170_v63 = vmax.f32 %v611_v7, 0.0 }
  0x16   :  { %463 = vpow2.f32 %v122_v28  ;;  %v171_v0 = vmax.f32 %v602_v1, 0.0  ;;  %v173_v28 = vmax.f32 %v615_v16, 0.0 }
  0x17   :  { %226 = vadd.xlane.f32.xlu1 %v220_v21  ;;  %228 = vadd.xlane.f32.xlu2 %v221_v22  ;;  %465 = vpow2.f32 %v120_v32  ;;  %v175_v7 = vsub.f32 %v170_v63, %v100_v41  ;;  %v174_v14 = vsub.f32 %v169_v62, %v99_v40 }
  0x18   :  { %211 = vadd.xlane.f32.xlu0 %v205_v24  ;;  %v176_v13 = vsub.f32 %v171_v0, %v101_v53 }
  0x19   :  { %v458_v29 = vpop.eup %457 }
  0x1a   :  { %v460_v33 = vpop.eup %459  ;;  %v142_v36 = vadd.f32 1.0, %v458_v29  ;;  %v145_v43 = vmul.f32 -0.5, %v458_v29  ;;  %v148_v59 = vand.u32 2147483647, %v458_v29 }
  0x1b   :  { %v462_v35 = vpop.eup %461  ;;  %v133_v37 = vadd.f32 1.0, %v460_v33  ;;  %v136_v42 = vmul.f32 -0.5, %v460_v33  ;;  %v139_v49 = vand.u32 2147483647, %v460_v33 }
  0x1c   :  { %v124_v38 = vadd.f32 1.0, %v462_v35  ;;  %467 = vlog2.f32 %v142_v36  ;;  %v464_v44 = vpop.eup %463  ;;  %v127_v47 = vmul.f32 -0.5, %v462_v35  ;;  %v146_v50 = vadd.f32 1.0, %v145_v43 }
  0x1d   :  { %469 = vlog2.f32 %v133_v37  ;;  %v466_v46 = vpop.eup %465  ;;  %v137_v48 = vadd.f32 1.0, %v136_v42  ;;  %v160_v51 = vadd.f32 1.0, %v464_v44  ;;  %v130_v61 = vand.u32 2147483647, %v462_v35 }
  0x1e   :  { %471 = vlog2.f32 %v124_v38  ;;  %v151_v54 = vadd.f32 1.0, %v466_v46  ;;  %v128_v58 = vadd.f32 1.0, %v127_v47  ;;  %vm635_vm0 = vcmp.lt.f32.partialorder %v139_v49, 0.0004427343 }
  0x1f   :  { %230 = vadd.xlane.f32.xlu1 %v222_v30  ;;  %217 = vadd.xlane.f32.xlu2 %v208_v31  ;;  %v138_v3 = vmul.f32 %v460_v33, %v137_v48  ;;  %v147_v5 = vmul.f32 %v458_v29, %v146_v50  ;;  %473 = vlog2.f32 %v160_v51  ;;  %v163_v9 = vmul.f32 -0.5, %v464_v44 }
  0x20   :  { %215 = vadd.xlane.f32.xlu0 %v207_v34  ;;  %475 = vlog2.f32 %v151_v54  ;;  %v129_v11 = vmul.f32 %v462_v35, %v128_v58  ;;  %vm639_vm1 = vcmp.lt.f32.partialorder %v148_v59, 0.0004427343  ;;  %v154_v2 = vmul.f32 -0.5, %v466_v46 }
  0x21   :  { %vm643_vm2 = vcmp.lt.f32.partialorder %v130_v61, 0.0004427343  ;;  %v164_v18 = vadd.f32 1.0, %v163_v9  ;;  %v166_v23 = vand.u32 2147483647, %v464_v44  ;;  %v172_v30 = vmax.f32 %v618_v19, 0.0 }
  0x22   :  { %v468_v52 = vpop.eup %467  ;;  %v155_v22 = vadd.f32 1.0, %v154_v2  ;;  %v157_v25 = vand.u32 2147483647, %v466_v46  ;;  %v178_v35 = vsub.f32 %v173_v28, %v103_v57 }
  0x23   :  { %v470_v55 = vpop.eup %469  ;;  %v144_v8 = vmul.f32 0.6931472, %v468_v52  ;;  %v165_v32 = vmul.f32 %v464_v44, %v164_v18  ;;  %vm167_vm3 = vcmp.lt.f32.partialorder %v166_v23, 0.0004427343  ;;  %v177_v36 = vsub.f32 %v172_v30, %v102_v56 }
  0x24   :  { %v472_v60 = vpop.eup %471  ;;  %v135_v6 = vmul.f32 0.6931472, %v470_v55  ;;  %v156_v34 = vmul.f32 %v466_v46, %v155_v22  ;;  %vm158_vm4 = vcmp.lt.f32.partialorder %v157_v25, 0.0004427343 }
  0x25   :  { %v126_v10 = vmul.f32 0.6931472, %v472_v60  ;;  %v150_v17 = vsel %vm639_vm1, %v147_v5, %v144_v8  ;;  %v474_v20 = vpop.eup %473 }
  0x26   :  { %v141_v15 = vsel %vm635_vm0, %v138_v3, %v135_v6  ;;  %v476_v24 = vpop.eup %475  ;;  %v181_v27 = vadd.f32 %v176_v13, %v150_v17  ;;  %v162_v31 = vmul.f32 0.6931472, %v474_v20 }
  0x27   :  { %194 = vadd.xlane.f32.xlu1 %v99_v40  ;;  %196 = vadd.xlane.f32.xlu2 %v100_v41  ;;  %v132_v21 = vsel %vm643_vm2, %v129_v11, %v126_v10  ;;  %v180_v26 = vadd.f32 %v175_v7, %v141_v15  ;;  %v153_v33 = vmul.f32 0.6931472, %v476_v24 }
  0x28   :  { %232 = vadd.xlane.f32.xlu0 %v223_v45  ;;  %v179_v29 = vadd.f32 %v174_v14, %v132_v21  ;;  %v168_v37 = vsel %vm167_vm3, %v165_v32, %v162_v31 }
  0x29   :  { %v159_v38 = vsel %vm158_vm4, %v156_v34, %v153_v33  ;;  %v183_v39 = vadd.f32 %v178_v35, %v168_v37 }
  0x2a   :  { %v182_v40 = vadd.f32 %v177_v36, %v159_v38 }
  0x2f   :  { %200 = vadd.xlane.f32.xlu1 %v102_v56  ;;  %202 = vadd.xlane.f32.xlu2 %v103_v57 }
  0x30   :  { %198 = vadd.xlane.f32.xlu0 %v101_v53 }
  0x37   :  { %186 = vadd.xlane.f32.xlu1 %v180_v26  ;;  %188 = vadd.xlane.f32.xlu2 %v181_v27 }
  0x38   :  { %184 = vadd.xlane.f32.xlu0 %v179_v29 }
  0x3f   :  { %192 = vadd.xlane.f32.xlu1 %v183_v39 }
  0x40   :  { %190 = vadd.xlane.f32.xlu0 %v182_v40 }
  0x82   :  { %v225_v16 = vpop.xlane.xlu1 %224  ;;  %v214_v41 = vpop.xlane.xlu2 %213 }
  0x83   :  { %v289_v19 = vmax.f32 %v225_v16, 1e-24  ;;  %v655_v42 = vmax.f32 %v214_v41, 1e-24  ;;  %v210_v43 = vpop.xlane.xlu0 %209 }
  0x84   :  { %v234_v44 = vmax.f32 %v210_v43, 1e-24 }
  0x85   :  { %477 = vrsqrt.f32 %v289_v19  ;;  %vm300_vm5 = vweird.f32 %v289_v19  ;;  %vm265_vm8 = vweird.f32 %v655_v42 }
  0x86   :  { %479 = vrsqrt.f32 %v655_v42  ;;  %vm245_vm9 = vweird.f32 %v234_v44 }
  0x87   :  { %481 = vrsqrt.f32 %v234_v44 }
  0x8a   :  { %v227_v45 = vpop.xlane.xlu1 %226  ;;  %v229_v46 = vpop.xlane.xlu2 %228 }
  0x8b   :  { %v658_v47 = vpop.eup %477  ;;  %v660_v48 = vmax.f32 %v227_v45, 1e-24  ;;  %v662_v49 = vmax.f32 %v229_v46, 1e-24  ;;  %v212_v50 = vpop.xlane.xlu0 %211 }
  0x8c   :  { %v664_v51 = vpop.eup %479  ;;  %v295_v52 = vmul.f32 %v658_v47, %v289_v19  ;;  %v667_v53 = vmax.f32 %v212_v50, 1e-24  ;;  %vm301_vm7 = vweird.f32 %v658_v47 }
  0x8d   :  { %v669_v54 = vpop.eup %481  ;;  %v260_v55 = vmul.f32 %v664_v51, %v655_v42  ;;  %483 = vrsqrt.f32 %v660_v48  ;;  %vm310_vm10 = vweird.f32 %v660_v48  ;;  %vm320_vm11 = vweird.f32 %v662_v49  ;;  %vm715_vm13 = vmor %vm300_vm5, %vm301_vm7 }
  0x8e   :  { %v296_v56 = vmul.f32 %v658_v47, %v295_v52  ;;  %v240_v57 = vmul.f32 %v669_v54, %v234_v44  ;;  %485 = vrsqrt.f32 %v662_v49  ;;  %vm246_vm6 = vweird.f32 %v669_v54 }
  0x8f   :  { %v261_v58 = vmul.f32 %v664_v51, %v260_v55  ;;  %487 = vrsqrt.f32 %v667_v53  ;;  %vm255_vm12 = vweird.f32 %v667_v53  ;;  %vm721_vm14 = vmor %vm245_vm9, %vm246_vm6  ;;  %vm266_vm15 = vweird.f32 %v664_v51 }
  0x90   :  { %v297_v59 = vmul.f32 0.5, %v296_v56  ;;  %v241_v60 = vmul.f32 %v669_v54, %v240_v57  ;;  %vm751_vm3 = vmor %vm265_vm8, %vm266_vm15 }
  0x91   :  { %v262_v4 = vmul.f32 0.5, %v261_v58 }
  0x92   :  { %v298_v61 = vsub.f32 1.5, %v297_v59  ;;  %v242_v62 = vmul.f32 0.5, %v241_v60  ;;  %v231_v63 = vpop.xlane.xlu1 %230  ;;  %v218_v0 = vpop.xlane.xlu2 %217 }
  0x93   :  { %v680_v3 = vpop.eup %483  ;;  %v682_v5 = vmax.f32 %v231_v63, 1e-24  ;;  %v684_v6 = vmax.f32 %v218_v0, 1e-24  ;;  %v216_v8 = vpop.xlane.xlu0 %215  ;;  %v263_v15 = vsub.f32 1.5, %v262_v4 }
  0x94   :  { %v686_v9 = vpop.eup %485  ;;  %v243_v10 = vsub.f32 1.5, %v242_v62  ;;  %v305_v11 = vmul.f32 %v680_v3, %v660_v48  ;;  %v690_v12 = vmax.f32 %v216_v8, 1e-24  ;;  %v299_v14 = vmul.f32 %v658_v47, %v298_v61 }
  0x95   :  { %v692_v2 = vpop.eup %487  ;;  %v315_v1 = vmul.f32 %v686_v9, %v662_v49  ;;  %489 = vrsqrt.f32 %v682_v5  ;;  %vm311_vm0 = vweird.f32 %v680_v3  ;;  %v264_v34 = vmul.f32 %v664_v51, %v263_v15 }
  0x96   :  { %v306_v7 = vmul.f32 %v680_v3, %v305_v11  ;;  %v250_v13 = vmul.f32 %v692_v2, %v667_v53  ;;  %491 = vrsqrt.f32 %v684_v6  ;;  %v244_v18 = vmul.f32 %v669_v54, %v243_v10  ;;  %vm764_vm5 = vmor %vm310_vm10, %vm311_vm0 }
  0x97   :  { %v316_v17 = vmul.f32 %v686_v9, %v315_v1  ;;  %493 = vrsqrt.f32 %v690_v12  ;;  %v303_v27 = vsel %vm715_vm13, %v658_v47, %v299_v14  ;;  %vm321_vm1 = vweird.f32 %v686_v9 }
  0x98   :  { %v307_v20 = vmul.f32 0.5, %v306_v7  ;;  %v251_v21 = vmul.f32 %v692_v2, %v250_v13  ;;  %v248_v33 = vsel %vm721_vm14, %v669_v54, %v244_v18  ;;  %vm256_vm2 = vweird.f32 %v692_v2  ;;  %vm322_vm6 = vmor %vm320_vm11, %vm321_vm1 }
  0x99   :  { %v317_v22 = vmul.f32 0.5, %v316_v17  ;;  %vm330_vm4 = vweird.f32 %v682_v5  ;;  %v344_v46 = vmul.f32 %v303_v27, %v248_v33  ;;  %vm257_vm7 = vmor %vm255_vm12, %vm256_vm2  ;;  %v268_v54 = vsel %vm751_vm3, %v664_v51, %v264_v34 }
  0x9a   :  { %v308_v24 = vsub.f32 1.5, %v307_v20  ;;  %v252_v25 = vmul.f32 0.5, %v251_v21  ;;  %v195_v28 = vpop.xlane.xlu1 %194  ;;  %v197_v29 = vpop.xlane.xlu2 %196  ;;  %vm275_vm10 = vweird.f32 %v690_v12  ;;  %vm374_vm13 = vcmask 7168  }
  0x9b   :  { %v729_v30 = vpop.eup %489  ;;  %v318_v31 = vsub.f32 1.5, %v317_v22  ;;  %v233_v32 = vpop.xlane.xlu0 %232  ;;  %v349_v57 = vmul.f32 %v344_v46, %v195_v28  ;;  %vm285_vm14 = vweird.f32 %v684_v6 }
  0x9c   :  { %v736_v35 = vpop.eup %491  ;;  %v253_v36 = vsub.f32 1.5, %v252_v25  ;;  %v325_v37 = vmul.f32 %v729_v30, %v682_v5  ;;  %v740_v38 = vmax.f32 %v233_v32, 1e-24  ;;  %v309_v16 = vmul.f32 %v680_v3, %v308_v24 }
  0x9d   :  { %v494_v39 = vpop.eup %493  ;;  %v280_v40 = vmul.f32 %v736_v35, %v684_v6  ;;  %v319_v19 = vmul.f32 %v686_v9, %v318_v31  ;;  %vm331_vm8 = vweird.f32 %v729_v30  ;;  %v354_v10 = vsub.f32 1.0, %v349_v57 }
  0x9e   :  { %v326_v43 = vmul.f32 %v729_v30, %v325_v37  ;;  %v270_v44 = vmul.f32 %v494_v39, %v690_v12  ;;  %495 = vrsqrt.f32 %v740_v38  ;;  %v313_v47 = vsel %vm764_vm5, %v680_v3, %v309_v16  ;;  %vm332_vm11 = vmor %vm330_vm4, %vm331_vm8 }
  0x9f   :  { %v281_v45 = vmul.f32 %v736_v35, %v280_v40  ;;  %v254_v50 = vmul.f32 %v692_v2, %v253_v36  ;;  %v323_v55 = vsel %vm322_vm6, %v686_v9, %v319_v19  ;;  %vm276_vm9 = vweird.f32 %v494_v39 }
  0xa0   :  { %v327_v52 = vmul.f32 0.5, %v326_v43  ;;  %v271_v48 = vmul.f32 %v494_v39, %v270_v44  ;;  %v346_v61 = vmul.f32 %v323_v55, %v268_v54  ;;  %vm277_vm12 = vmor %vm275_vm10, %vm276_vm9  ;;  %v359_v20 = vmul.f32 %v354_v10, %v354_v10 }
  0xa1   :  { %v282_v56 = vmul.f32 0.5, %v281_v45  ;;  %v258_v58 = vsel %vm257_vm7, %v692_v2, %v254_v50  ;;  %vm286_vm15 = vweird.f32 %v736_v35  ;;  %vm340_vm1 = vweird.f32 %v740_v38 }
  0xa2   :  { %v328_v49 = vsub.f32 1.5, %v327_v52  ;;  %v272_v59 = vmul.f32 0.5, %v271_v48  ;;  %v345_v60 = vmul.f32 %v313_v47, %v258_v58  ;;  %v201_v62 = vpop.xlane.xlu1 %200  ;;  %v203_v63 = vpop.xlane.xlu2 %202  ;;  %vm287_vm2 = vmor %vm285_vm14, %vm286_vm15  ;;  %v364_v33 = vmul.f32 %v359_v20, %v354_v10 }
  0xa3   :  { %v199_v53 = vpop.xlane.xlu0 %198  ;;  %v283_v11 = vsub.f32 1.5, %v282_v56  ;;  %vm68_vm4 = vcmask 0  }
  0xa4   :  { %v496_v0 = vpop.eup %495  ;;  %v273_v3 = vsub.f32 1.5, %v272_v59  ;;  %v350_v4 = vmul.f32 %v345_v60, %v197_v29  ;;  %v351_v51 = vmul.f32 %v346_v61, %v199_v53  ;;  %v329_v8 = vmul.f32 %v729_v30, %v328_v49 }
  0xa5   :  { %v335_v9 = vmul.f32 %v496_v0, %v740_v38  ;;  %v284_v5 = vmul.f32 %v736_v35, %v283_v11  ;;  %vm341_vm0 = vweird.f32 %v496_v0  ;;  %v399_v38 = vsel %vm374_vm13, %v364_v33, 0.0 }
  0xa6   :  { %v355_v2 = vsub.f32 1.0, %v350_v4  ;;  %v274_v1 = vmul.f32 %v494_v39, %v273_v3  ;;  %v333_v7 = vsel %vm332_vm11, %v729_v30, %v329_v8  ;;  %v356_v15 = vsub.f32 1.0, %v351_v51  ;;  %vm342_vm3 = vmor %vm340_vm1, %vm341_vm0 }
  0xa7   :  { %v336_v13 = vmul.f32 %v496_v0, %v335_v9  ;;  %v288_v37 = vsel %vm287_vm2, %v736_v35, %v284_v5 }
  0xa8   :  { %v360_v14 = vmul.f32 %v355_v2, %v355_v2  ;;  %v278_v17 = vsel %vm277_vm12, %v494_v39, %v274_v1  ;;  %v361_v28 = vmul.f32 %v356_v15, %v356_v15  ;;  %v579_v1 = vmov 0.0  }
  0xa9   :  { %v337_v12 = vmul.f32 0.5, %v336_v13  ;;  %v347_v18 = vmul.f32 %v333_v7, %v278_v17  ;;  %69 = vst.msk [vmem:[#allocation7] sm:$0x1] %vm68_vm4, %v579_v1 }
  0xaa   :  { %v187_v21 = vpop.xlane.xlu1 %186  ;;  %v189_v26 = vpop.xlane.xlu2 %188  ;;  %v365_v27 = vmul.f32 %v360_v14, %v355_v2  ;;  %v366_v16 = vmul.f32 %v361_v28, %v356_v15 }
  0xab   :  { %v338_v22 = vsub.f32 1.5, %v337_v12  ;;  %v352_v23 = vmul.f32 %v347_v18, %v201_v62  ;;  %v185_v24 = vpop.xlane.xlu0 %184  ;;  %v376_v25 = vsel %vm374_vm13, %v187_v21, 0.0  ;;  %v378_v34 = vsel %vm374_vm13, %v189_v26, 0.0 }
  0xac   :  { %v375_v29 = vsel %vm374_vm13, %v185_v24, 0.0  ;;  %v400_v40 = vsel %vm374_vm13, %v365_v27, 0.0  ;;  %v402_v46 = vsel %vm374_vm13, %v366_v16, 0.0 }
  0xad   :  { %v357_v30 = vsub.f32 1.0, %v352_v23  ;;  %v339_v31 = vmul.f32 %v496_v0, %v338_v22  ;;  %v377_v32 = vadd.f32 %v376_v25, %v375_v29  ;;  %v401_v42 = vadd.f32 %v400_v40, %v399_v38 }
  0xaf   :  { %v362_v36 = vmul.f32 %v357_v30, %v357_v30  ;;  %v343_v39 = vsel %vm342_vm3, %v496_v0, %v339_v31  ;;  %v379_v19 = vadd.f32 %v378_v34, %v377_v32  ;;  %v403_v56 = vadd.f32 %v402_v46, %v401_v42 }
  0xb0   :  { %v348_v41 = vmul.f32 %v343_v39, %v288_v37  ;;  %v421_v17 = vld [vmem:[#allocation7] sm:$0x1] }
  0xb1   :  { %v367_v43 = vmul.f32 %v362_v36, %v357_v30 }
  0xb2   :  { %v353_v6 = vmul.f32 %v348_v41, %v203_v63  ;;  %v193_v44 = vpop.xlane.xlu1 %192 }
  0xb3   :  { %v191_v45 = vpop.xlane.xlu0 %190  ;;  %v382_v35 = vsel %vm374_vm13, %v193_v44, 0.0  ;;  %v404_v54 = vsel %vm374_vm13, %v367_v43, 0.0 }
  0xb4   :  { %v358_v47 = vsub.f32 1.0, %v353_v6  ;;  %v380_v50 = vsel %vm374_vm13, %v191_v45, 0.0  ;;  %v405_v58 = vadd.f32 %v404_v54, %v403_v56 }
  0xb5   :  { %v381_v52 = vadd.f32 %v380_v50, %v379_v19 }
  0xb6   :  { %v363_v48 = vmul.f32 %v358_v47, %v358_v47 }
  0xb7   :  { %v383_v55 = vadd.f32 %v382_v35, %v381_v52 }
  0xb8   :  { %v368_v57 = vmul.f32 %v363_v48, %v358_v47 }
  0xb9   :  { %384 = vadd.xlane.f32.xlu2 %v383_v55 }
  0xba   :  { %v406_v49 = vsel %vm374_vm13, %v368_v57, 0.0 }
  0xbb   :  { %v407_v59 = vadd.f32 %v406_v49, %v405_v58 }
  0xbd   :  { %408 = vadd.xlane.f32.xlu0 %v407_v59 }
 0x12c   :  { %v385_v60 = vpop.xlane.xlu2 %384 }
 0x12d   :  { %v386_v61 = vrot.slane %v385_v60, 4 }
 0x12f   :  { %v387_v62 = vadd.f32 %v386_v61, %v385_v60 }
 0x130   :  { %v409_v63 = vpop.xlane.xlu0 %408 }
 0x131   :  { %v388_v53 = vrot.slane %v387_v62, 2  ;;  %v410_v0 = vrot.slane %v409_v63, 4 }
 0x133   :  { %v411_v3 = vadd.f32 %v410_v0, %v409_v63  ;;  %v389_v4 = vadd.f32 %v388_v53, %v387_v62 }
 0x135   :  { %v412_v51 = vrot.slane %v411_v3, 2  ;;  %v390_v8 = vrot.slane %v389_v4, 1 }
 0x137   :  { %v413_v9 = vadd.f32 %v412_v51, %v411_v3  ;;  %v391_v10 = vadd.f32 %v390_v8, %v389_v4 }
 0x139   :  { %447 = vpush %v391_v10  ;;  %v414_v11 = vrot.slane %v413_v9, 1 }
 0x13b   :  { %v415_v2 = vadd.f32 %v414_v11, %v413_v9 }
 0x13d   :  { %449 = vpush %v415_v2 }
 0x16a   :  { %s448_s0 = spop %447 }
 0x16b   :  { %v393_v7 = vstv %s448_s0 }
 0x16c   :  { %v418_v14 = vmul.f32 0.00015625, %v393_v7 }
 0x16e   :  { %s450_s1 = spop %449 }
 0x16f   :  { %v417_v13 = vstv %s450_s1 }
 0x170   :  { %v419_v15 = vmul.f32 0.005, %v417_v13 }
 0x172   :  { %v420_v12 = vadd.f32 %v419_v15, %v418_v14 }
 0x174   :  { %v422_v18 = vadd.f32 %v421_v17, %v420_v12 }
 0x176   :  { %424 = vst.msk [vmem:[#allocation7] sm:$0x1] %vm68_vm4, %v422_v18 }
 0x177   :  { %435 = dma.vmem_to_hbm [thread:$0]  %s431_s22, 16, %s433_s25, [#allocation4]  }
 0x178   :  { %573 = dma.done.wait [#allocation4], 16  }
 0x179   :  { %574 = vsyncadd [#allocation4], 4294967280 }
 0x17a   :  { %440 = vsyncpa [#allocation3], 1 }
 0x17b   :  { %441 = vsyncpa [#allocation6], 1 }
 0x17c   :  { %442 = vsyncpa [#allocation4], 1 }

</bundles_post_ra>
